<compile_context>
chip_gen: v5e
topology: v5e:2x2
jax: 0.10.0
libtpu: 0.0.40
codegen_flags: <defaults>
</compile_context>

<pallas_src>
import jax
import jax.numpy as jnp
from jax.experimental import pallas as pl
from jax.experimental.pallas import tpu as pltpu

IN_FEATURES = 50 * 4 * 4   # 800
HIDDEN = 100
OUT_FEATURES = 10
BN_EPS = 1e-5

HID_PAD = 128              # hidden width padded to one lane group inside kernel


def _round_up(n, m):
    return (n + m - 1) // m * m


def classifier_kernel(x_ref, w1_ref, b1_ref, w2_ref, b2_ref, w3_ref, b3_ref, o_ref):
    # Layer 1: Linear(800->100) with eval-mode BatchNorm folded into W/b, + ReLU.
    # x arrives as f32 straight from HBM; cast to bf16 right before the MXU dot.
    x = x_ref[...].astype(w1_ref.dtype)                              # [TB, 800] bf16
    h1 = jnp.dot(x, w1_ref[...], preferred_element_type=jnp.float32) + b1_ref[...]
    h1 = jnp.maximum(h1, 0.0)                                        # f32 epilogue

    # Dropout2d: identity in eval mode.

    # Layer 2: Linear(100->100) + folded BatchNorm + ReLU.
    h2 = jnp.dot(h1.astype(w2_ref.dtype), w2_ref[...],
                 preferred_element_type=jnp.float32) + b2_ref[...]
    h2 = jnp.maximum(h2, 0.0)

    # Layer 3: Linear(100->10), stored as an unpadded [TB, 10] f32 tile.
    o_ref[...] = jnp.dot(h2.astype(w3_ref.dtype), w3_ref[...],
                         preferred_element_type=jnp.float32) + b3_ref[...]


def pack_params(params, compute_dtype=jnp.bfloat16):
    """Fold eval-mode BatchNorm into the linears and pad to kernel shapes.

    Called once at init (hoisted out of the per-call path)."""
    (w1, b1, g1, beta1, rm1, rv1,
     w2, b2, g2, beta2, rm2, rv2,
     w3, b3) = params

    s1 = g1 / jnp.sqrt(rv1 + BN_EPS)
    s2 = g2 / jnp.sqrt(rv2 + BN_EPS)
    w1f = w1.T * s1[None, :]                       # [800, 100]
    b1f = b1 * s1 + (beta1 - rm1 * s1)             # [100]
    w2f = w2.T * s2[None, :]                       # [100, 100]
    b2f = b2 * s2 + (beta2 - rm2 * s2)             # [100]

    # Pad only the hidden width to 128 lanes; K=800 and N=10 stay unpadded
    # (their blocks cover the full array dim). Weights in bf16, biases f32.
    w1p = jnp.zeros((IN_FEATURES, HID_PAD), compute_dtype
                    ).at[:, :HIDDEN].set(w1f.astype(compute_dtype))
    w2p = jnp.zeros((HID_PAD, HID_PAD), compute_dtype
                    ).at[:HIDDEN, :HIDDEN].set(w2f.astype(compute_dtype))
    w3p = jnp.zeros((HID_PAD, OUT_FEATURES), compute_dtype
                    ).at[:HIDDEN, :].set(w3.T.astype(compute_dtype))
    b1p = jnp.zeros((1, HID_PAD), jnp.float32).at[0, :HIDDEN].set(b1f)
    b2p = jnp.zeros((1, HID_PAD), jnp.float32).at[0, :HIDDEN].set(b2f)
    b3p = b3.reshape(1, OUT_FEATURES).astype(jnp.float32)
    return (w1p, b1p, w2p, b2p, w3p, b3p)


def classifier_forward(x, packed, *, tb=2048):
    """x: [B, 800] float32, packed = pack_params(...) -> [B, 10] float32."""
    w1p, b1p, w2p, b2p, w3p, b3p = packed
    B = x.shape[0]

    # Batch tile policy:
    #  * as large as reasonable (amortizes ~0.35us per-grid-step overhead),
    #  * never larger than the sublane-rounded batch,
    #  * >=2 grid blocks when the batch allows it (v7x has 2 TCs, batch axis is
    #    "parallel"),
    #  * a multiple of 8 rows (f32 sublane); partial last block handles B%tb.
    b_ceil = _round_up(B, 8)
    tb = min(tb, b_ceil)
    if b_ceil >= 16:
        tb = min(tb, _round_up((b_ceil + 1) // 2, 8))
    tb = _round_up(max(tb, 8), 8)

    grid = (pl.cdiv(B, tb),)
    const = lambda i: (0, 0)

    n_rows = grid[0] * tb
    flops = 2 * n_rows * (IN_FEATURES * HID_PAD
                          + HID_PAD * HID_PAD
                          + HID_PAD * OUT_FEATURES)
    bytes_accessed = (x.size * x.dtype.itemsize
                      + (w1p.size + w2p.size + w3p.size) * 2
                      + (b1p.size + b2p.size + b3p.size) * 4
                      + B * OUT_FEATURES * 4)

    return pl.pallas_call(
        classifier_kernel,
        out_shape=jax.ShapeDtypeStruct((B, OUT_FEATURES), jnp.float32),
        grid=grid,
        in_specs=[
            pl.BlockSpec((tb, IN_FEATURES), lambda i: (i, 0)),   # streamed x tile
            pl.BlockSpec((IN_FEATURES, HID_PAD), const),         # resident weights
            pl.BlockSpec((1, HID_PAD), const),
            pl.BlockSpec((HID_PAD, HID_PAD), const),
            pl.BlockSpec((1, HID_PAD), const),
            pl.BlockSpec((HID_PAD, OUT_FEATURES), const),
            pl.BlockSpec((1, OUT_FEATURES), const),
        ],
        out_specs=pl.BlockSpec((tb, OUT_FEATURES), lambda i: (i, 0)),
        compiler_params=pltpu.CompilerParams(
            dimension_semantics=("parallel",),
            vmem_limit_bytes=32 * 1024 * 1024,
        ),
        cost_estimate=pl.CostEstimate(
            flops=flops, transcendentals=0, bytes_accessed=bytes_accessed),
    )(x, w1p, b1p, w2p, b2p, w3p, b3p)


def init_params(key):
    """Deterministic synthetic parameters matching the PyTorch module shapes."""
    ks = jax.random.split(key, 10)
    # Linear weights in PyTorch layout [out, in]; biases [out].
    w1 = jax.random.normal(ks[0], (HIDDEN, IN_FEATURES), jnp.float32) * 0.02
    b1 = jax.random.normal(ks[1], (HIDDEN,), jnp.float32) * 0.02
    w2 = jax.random.normal(ks[2], (HIDDEN, HIDDEN), jnp.float32) * 0.02
    b2 = jax.random.normal(ks[3], (HIDDEN,), jnp.float32) * 0.02
    w3 = jax.random.normal(ks[4], (OUT_FEATURES, HIDDEN), jnp.float32) * 0.02
    b3 = jax.random.normal(ks[5], (OUT_FEATURES,), jnp.float32) * 0.02
    # BatchNorm1d params (gamma, beta, running_mean, running_var).
    g1 = 1.0 + 0.1 * jax.random.normal(ks[6], (HIDDEN,), jnp.float32)
    beta1 = 0.1 * jax.random.normal(ks[7], (HIDDEN,), jnp.float32)
    rm1 = 0.1 * jax.random.normal(ks[8], (HIDDEN,), jnp.float32)
    rv1 = jnp.abs(1.0 + 0.1 * jax.random.normal(ks[9], (HIDDEN,), jnp.float32))
    ks2 = jax.random.split(ks[0], 4)
    g2 = 1.0 + 0.1 * jax.random.normal(ks2[0], (HIDDEN,), jnp.float32)
    beta2 = 0.1 * jax.random.normal(ks2[1], (HIDDEN,), jnp.float32)
    rm2 = 0.1 * jax.random.normal(ks2[2], (HIDDEN,), jnp.float32)
    rv2 = jnp.abs(1.0 + 0.1 * jax.random.normal(ks2[3], (HIDDEN,), jnp.float32))
    return (w1, b1, g1, beta1, rm1, rv1,
            w2, b2, g2, beta2, rm2, rv2,
            w3, b3)


def reference_forward_f32(x, params):
    """Pure-JAX f32 reference with identical eval-mode semantics."""
    (w1, b1, g1, beta1, rm1, rv1,
     w2, b2, g2, beta2, rm2, rv2,
     w3, b3) = params
    h = x @ w1.T + b1
    h = (h - rm1) / jnp.sqrt(rv1 + BN_EPS) * g1 + beta1
    h = jnp.maximum(h, 0.0)
    h = h @ w2.T + b2
    h = (h - rm2) / jnp.sqrt(rv2 + BN_EPS) * g2 + beta2
    h = jnp.maximum(h, 0.0)
    return h @ w3.T + b3


def reference_forward_bf16(x, params):
    """Reference that mirrors the kernel's bf16-input / f32-accumulate math."""
    (w1, b1, g1, beta1, rm1, rv1,
     w2, b2, g2, beta2, rm2, rv2,
     w3, b3) = params
    s1 = g1 / jnp.sqrt(rv1 + BN_EPS)
    s2 = g2 / jnp.sqrt(rv2 + BN_EPS)
    w1f = (w1.T * s1[None, :]).astype(jnp.bfloat16)
    b1f = b1 * s1 + (beta1 - rm1 * s1)
    w2f = (w2.T * s2[None, :]).astype(jnp.bfloat16)
    b2f = b2 * s2 + (beta2 - rm2 * s2)
    w3f = w3.T.astype(jnp.bfloat16)

    h = jnp.dot(x.astype(jnp.bfloat16), w1f, preferred_element_type=jnp.float32) + b1f
    h = jnp.maximum(h, 0.0)
    h = jnp.dot(h.astype(jnp.bfloat16), w2f, preferred_element_type=jnp.float32) + b2f
    h = jnp.maximum(h, 0.0)
    return jnp.dot(h.astype(jnp.bfloat16), w3f, preferred_element_type=jnp.float32) + b3


if __name__ == "__main__":
    key = jax.random.PRNGKey(0)
    kx, kp = jax.random.split(key)

    params = init_params(kp)
    packed = pack_params(params)                 # BN folding + padding, done once

    fwd = jax.jit(lambda xx: classifier_forward(xx, packed))

    # B=8: exact-tile path; B=13: exercises the partial-last-block path.
    for B in (8, 13):
        x = jax.random.normal(jax.random.fold_in(kx, B), (B, IN_FEATURES),
                              jnp.float32)
        out = jax.block_until_ready(fwd(x))
        assert out.shape == (B, OUT_FEATURES), out.shape

        # Exact-semantics check against a reference mirroring the kernel's
        # bf16-input / f32-accumulate math.
        ref_bf16 = reference_forward_bf16(x, params)
        assert jnp.allclose(out, ref_bf16, atol=1e-3, rtol=1e-3), (
            float(jnp.max(jnp.abs(out - ref_bf16))))

        # Loose sanity check against the pure-f32 reference (bf16 quant only).
        ref_f32 = reference_forward_f32(x, params)
        assert jnp.allclose(out, ref_f32, atol=5e-2, rtol=5e-2), (
            float(jnp.max(jnp.abs(out - ref_f32))))

    print("KERNEL_OK")
</pallas_src>

<mosaic_0001>
module attributes {stable_mosaic.version = 11 : i64} {
  func.func @classifier_kernel(%arg0: i32, %arg1: memref<8x800xf32, #tpu.memory_space<vmem>>, %arg2: memref<800x128xbf16, #tpu.memory_space<vmem>>, %arg3: memref<1x128xf32, #tpu.memory_space<vmem>>, %arg4: memref<128x128xbf16, #tpu.memory_space<vmem>>, %arg5: memref<1x128xf32, #tpu.memory_space<vmem>>, %arg6: memref<128x10xbf16, #tpu.memory_space<vmem>>, %arg7: memref<1x10xf32, #tpu.memory_space<vmem>>, %arg8: memref<8x10xf32, #tpu.memory_space<vmem>>) attributes {dimension_semantics = [#tpu.dimension_semantics<parallel>], iteration_bounds = array<i64: 1>, scalar_prefetch = 0 : i64, scratch_operands = 0 : i64, tpu.core_type = #tpu.core_type<tc>, window_params = [{transform_indices = @transform_0, window_bounds = array<i64: 8, 800>}, {pipeline_mode = #tpu.pipeline_mode<synchronous>, transform_indices = @transform_1, window_bounds = array<i64: 800, 128>}, {pipeline_mode = #tpu.pipeline_mode<synchronous>, transform_indices = @transform_2, window_bounds = array<i64: 1, 128>}, {pipeline_mode = #tpu.pipeline_mode<synchronous>, transform_indices = @transform_3, window_bounds = array<i64: 128, 128>}, {pipeline_mode = #tpu.pipeline_mode<synchronous>, transform_indices = @transform_4, window_bounds = array<i64: 1, 128>}, {pipeline_mode = #tpu.pipeline_mode<synchronous>, transform_indices = @transform_5, window_bounds = array<i64: 128, 10>}, {pipeline_mode = #tpu.pipeline_mode<synchronous>, transform_indices = @transform_6, window_bounds = array<i64: 1, 10>}, {transform_indices = @transform_7, window_bounds = array<i64: 8, 10>}]} {
    %c0 = arith.constant 0 : index
    %c0_0 = arith.constant 0 : index
    %0 = vector.load %arg1[%c0, %c0_0] : memref<8x800xf32, #tpu.memory_space<vmem>>, vector<8x800xf32>
    %1 = arith.truncf %0 : vector<8x800xf32> to vector<8x800xbf16>
    %c0_1 = arith.constant 0 : index
    %c0_2 = arith.constant 0 : index
    %2 = vector.load %arg2[%c0_1, %c0_2] : memref<800x128xbf16, #tpu.memory_space<vmem>>, vector<800x128xbf16>
    %cst = arith.constant dense<0.000000e+00> : vector<8x128xf32>
    %3 = tpu.matmul %1, %2, %cst {dimension_numbers = #tpu.dot_dimension_numbers<[1], [0], [0], [1], [0, 0, 1, 1], [], []>} : vector<8x800xbf16>, vector<800x128xbf16>, vector<8x128xf32> -> vector<8x128xf32>
    %c0_3 = arith.constant 0 : index
    %c0_4 = arith.constant 0 : index
    %4 = vector.load %arg3[%c0_3, %c0_4] : memref<1x128xf32, #tpu.memory_space<vmem>>, vector<1x128xf32>
    %5 = vector.broadcast %4 : vector<1x128xf32> to vector<8x128xf32>
    %6 = arith.addf %3, %5 : vector<8x128xf32>
    %cst_5 = arith.constant 0.000000e+00 : f32
    %7 = vector.broadcast %cst_5 : f32 to vector<8x128xf32>
    %8 = arith.maximumf %6, %7 : vector<8x128xf32>
    %9 = arith.truncf %8 : vector<8x128xf32> to vector<8x128xbf16>
    %c0_6 = arith.constant 0 : index
    %c0_7 = arith.constant 0 : index
    %10 = vector.load %arg4[%c0_6, %c0_7] : memref<128x128xbf16, #tpu.memory_space<vmem>>, vector<128x128xbf16>
    %cst_8 = arith.constant dense<0.000000e+00> : vector<8x128xf32>
    %11 = tpu.matmul %9, %10, %cst_8 {dimension_numbers = #tpu.dot_dimension_numbers<[1], [0], [0], [1], [0, 0, 1, 1], [], []>} : vector<8x128xbf16>, vector<128x128xbf16>, vector<8x128xf32> -> vector<8x128xf32>
    %c0_9 = arith.constant 0 : index
    %c0_10 = arith.constant 0 : index
    %12 = vector.load %arg5[%c0_9, %c0_10] : memref<1x128xf32, #tpu.memory_space<vmem>>, vector<1x128xf32>
    %13 = vector.broadcast %12 : vector<1x128xf32> to vector<8x128xf32>
    %14 = arith.addf %11, %13 : vector<8x128xf32>
    %cst_11 = arith.constant 0.000000e+00 : f32
    %15 = vector.broadcast %cst_11 : f32 to vector<8x128xf32>
    %16 = arith.maximumf %14, %15 : vector<8x128xf32>
    %17 = arith.truncf %16 : vector<8x128xf32> to vector<8x128xbf16>
    %c0_12 = arith.constant 0 : index
    %c0_13 = arith.constant 0 : index
    %18 = vector.load %arg6[%c0_12, %c0_13] : memref<128x10xbf16, #tpu.memory_space<vmem>>, vector<128x10xbf16>
    %cst_14 = arith.constant dense<0.000000e+00> : vector<8x10xf32>
    %19 = tpu.matmul %17, %18, %cst_14 {dimension_numbers = #tpu.dot_dimension_numbers<[1], [0], [0], [1], [0, 0, 1, 1], [], []>} : vector<8x128xbf16>, vector<128x10xbf16>, vector<8x10xf32> -> vector<8x10xf32>
    %c0_15 = arith.constant 0 : index
    %c0_16 = arith.constant 0 : index
    %20 = vector.load %arg7[%c0_15, %c0_16] : memref<1x10xf32, #tpu.memory_space<vmem>>, vector<1x10xf32>
    %21 = vector.broadcast %20 : vector<1x10xf32> to vector<8x10xf32>
    %22 = arith.addf %19, %21 : vector<8x10xf32>
    %c0_17 = arith.constant 0 : index
    %c0_18 = arith.constant 0 : index
    %23 = vector.load %arg8[%c0_17, %c0_18] : memref<8x10xf32, #tpu.memory_space<vmem>>, vector<8x10xf32>
    tpu.vector_store %arg8[%c0_17, %c0_18], %22 {strides = array<i32>} : memref<8x10xf32, #tpu.memory_space<vmem>>, vector<8x10xf32>,
    return
  }
  func.func @transform_0(%arg0: i32) -> (i32, i32) {
    %c0_i32 = arith.constant 0 : i32
    %c0_i32_0 = arith.constant 0 : i32
    return %arg0, %c0_i32 : i32, i32
  }
  func.func @transform_1(%arg0: i32) -> (i32, i32) {
    %c0_i32 = arith.constant 0 : i32
    %c0_i32_0 = arith.constant 0 : i32
    %c0_i32_1 = arith.constant 0 : i32
    return %c0_i32, %c0_i32_0 : i32, i32
  }
  func.func @transform_2(%arg0: i32) -> (i32, i32) {
    %c0_i32 = arith.constant 0 : i32
    %c0_i32_0 = arith.constant 0 : i32
    %c0_i32_1 = arith.constant 0 : i32
    return %c0_i32, %c0_i32_0 : i32, i32
  }
  func.func @transform_3(%arg0: i32) -> (i32, i32) {
    %c0_i32 = arith.constant 0 : i32
    %c0_i32_0 = arith.constant 0 : i32
    %c0_i32_1 = arith.constant 0 : i32
    return %c0_i32, %c0_i32_0 : i32, i32
  }
  func.func @transform_4(%arg0: i32) -> (i32, i32) {
    %c0_i32 = arith.constant 0 : i32
    %c0_i32_0 = arith.constant 0 : i32
    %c0_i32_1 = arith.constant 0 : i32
    return %c0_i32, %c0_i32_0 : i32, i32
  }
  func.func @transform_5(%arg0: i32) -> (i32, i32) {
    %c0_i32 = arith.constant 0 : i32
    %c0_i32_0 = arith.constant 0 : i32
    %c0_i32_1 = arith.constant 0 : i32
    return %c0_i32, %c0_i32_0 : i32, i32
  }
  func.func @transform_6(%arg0: i32) -> (i32, i32) {
    %c0_i32 = arith.constant 0 : i32
    %c0_i32_0 = arith.constant 0 : i32
    %c0_i32_1 = arith.constant 0 : i32
    return %c0_i32, %c0_i32_0 : i32, i32
  }
  func.func @transform_7(%arg0: i32) -> (i32, i32) {
    %c0_i32 = arith.constant 0 : i32
    %c0_i32_0 = arith.constant 0 : i32
    return %arg0, %c0_i32 : i32, i32
  }
}

</mosaic_0001>

<bundles_post_ra>
// kernel: _lambda_.1
= control target key start
LH: loop header
LB: loop body
LE: loop exit
PB: predicated region body
PF: predicated region fallthrough
CT: control target
= control target key end

     0   :  { %12 = vsyncpa [#allocation3], 0  ;;  %s1368_s0 = inlined_call_operand.hbm [shape: f32[8,800], index: 0, kind: input, shape index: {}]   ;;  %s1369_s1 = inlined_call_operand.hbm [shape: bf16[800,128], index: 1, kind: input, shape index: {}]   ;;  %s1370_s2 = inlined_call_operand.hbm [shape: f32[1,128], index: 2, kind: input, shape index: {}]   ;;  %s1371_s3 = inlined_call_operand.hbm [shape: bf16[128,128], index: 3, kind: input, shape index: {}]   ;;  %s1372_s4 = inlined_call_operand.vmem [shape: f32[1,128], index: 4, kind: input, shape index: {}]   ;;  %s1373_s5 = inlined_call_operand.hbm [shape: bf16[128,10], index: 5, kind: input, shape index: {}]   ;;  %s1374_s6 = inlined_call_operand.vmem [shape: f32[1,10], index: 6, kind: input, shape index: {}]   ;;  %s1375_s7 = inlined_call_operand.hbm [shape: f32[8,10], index: 7, kind: output, shape index: {}]  }
   0x1   :  { %13 = vsyncpa [#allocation6], 0 }
   0x2   :  { %14 = vsyncpa [#allocation9], 0  ;;  %s31_s26 = sshll.u32 %s1369_s1, 4  ;;  %s32_s26 = int_to_ptr.hbm [resolvable:$true] %s31_s26 }
   0x3   :  { %15 = vsyncpa [#allocation4], 0  ;;  %s1296_s27 = smov [#allocation5]   ;;  %s55_s8 = sshll.u32 %s1371_s3, 4  ;;  %s56_s8 = int_to_ptr.hbm [resolvable:$true] %s55_s8 }
   0x4   :  { %s33_s28 = sshll.u32 %s1296_s27, 4  ;;  %s1297_s9 = smov 64   ;;  %s34_s28 = int_to_ptr.vmem [resolvable:$true] %s33_s28 }
   0x5   :  { %s1298_s10 = smov 4   ;;  %s1299_s11 = smov [#allocation8]  }
   0x6   :  { %39 = dma.hbm_to_vmem [thread:$0]  %s32_s26, 6400, %s34_s28, [#allocation6], %s1297_s9, %s1297_s9, %s1298_s10  }
   0x7   :  { %s57_s12 = sshll.u32 %s1299_s11, 4  ;;  %s21_s15 = sshll.u32 %s1368_s0, 4  ;;  %s58_s12 = int_to_ptr.vmem [resolvable:$true] %s57_s12  ;;  %s22_s15 = int_to_ptr.hbm [resolvable:$true] %s21_s15 }
   0x8   :  { %63 = dma.hbm_to_vmem [thread:$0]  %s56_s8, 1024, %s58_s12, [#allocation9], %s1297_s9, %s1297_s9, %s1298_s10  }
   0x9   :  { %s45_s17 = sshll.u32 %s1370_s2, 4  ;;  %s1300_s18 = smov [#allocation2]   ;;  %s46_s17 = int_to_ptr.hbm [resolvable:$true] %s45_s17 }
   0xa   :  { %s23_s19 = sshll.u32 %s1300_s18, 4  ;;  %s1301_s3 = smov [#allocation7]   ;;  %s24_s19 = int_to_ptr.vmem [resolvable:$true] %s23_s19 }
   0xb   :  { %26 = dma.hbm_to_vmem [thread:$0]  %s22_s15, 896, %s24_s19, [#allocation3]  }
   0xc   :  { %s47_s20 = sshll.u32 %s1301_s3, 4  ;;  %s70_s23 = sshll.u32 %s1373_s5, 4  ;;  %s48_s20 = int_to_ptr.vmem [resolvable:$true] %s47_s20  ;;  %s71_s23 = int_to_ptr.hbm [resolvable:$true] %s70_s23 }
   0xd   :  { %50 = dma.hbm_to_vmem [thread:$0]  %s46_s17, 16, %s48_s20, [#allocation6]  }
   0xe   :  { %s1302_s0 = smov [#allocation10]  }
   0xf   :  { %s72_s24 = sshll.u32 %s1302_s0, 4  ;;  %s73_s24 = int_to_ptr.vmem [resolvable:$true] %s72_s24 }
  0x10   :  { %78 = dma.hbm_to_vmem [thread:$0]  %s71_s23, 1024, %s73_s24, [#allocation9], %s1297_s9, %s1297_s9, %s1298_s10  }
  0x11   :  { %1288 = dma.done.wait [#allocation3], 896  }
  0x12   :  { %1289 = vsyncadd [#allocation3], 4294966400 }
  0x13   :  { %1290 = dma.done.wait [#allocation6], 6416  }
  0x14   :  { %1291 = vsyncadd [#allocation6], 4294960880 }
  0x15   :  { %1292 = dma.done.wait [#allocation9], 2048  }
  0x16   :  { %1293 = vsyncadd [#allocation9], 4294965248  ;;  %v1074_v0 = vld [vmem:[#allocation5 + $0x38] sm:$0xff]  ;;  %v1073_v3 = vld [vmem:[#allocation5 + $0x30] sm:$0xff]  ;;  %vm520_vm0 = vcmask 261120   ;;  %s1303_s27 = smov [#allocation11]  }
  0x17   :  { %v1082_v1 = vld [vmem:[#allocation5 + $0x78] sm:$0xff]  ;;  %524 = vmatpush.bf16.msra.mxu0 %v1074_v0  ;;  %v1081_v4 = vld [vmem:[#allocation5 + $0x70] sm:$0xff]  ;;  %v1072_v8 = vld [vmem:[#allocation5 + $0x28] sm:$0xff]  ;;  %s788_s28 = sshll.u32 %s1303_s27, 4  ;;  %s790_s8 = sshll.u32 %s1375_s7, 4  ;;  %vm781_vm1 = vcmask 80896   ;;  %s789_s28 = int_to_ptr.vmem [resolvable:$true] %s788_s28  ;;  %s791_s8 = int_to_ptr.hbm [resolvable:$true] %s790_s8 }
  0x18   :  { %v1090_v2 = vld [vmem:[#allocation5 + $0xb8] sm:$0xff]  ;;  %537 = vmatpush.bf16.msra.mxu1 %v1082_v1  ;;  %v1089_v5 = vld [vmem:[#allocation5 + $0xb0] sm:$0xff]  ;;  %v1080_v9 = vld [vmem:[#allocation5 + $0x68] sm:$0xff] }
  0x19   :  { %550 = vmatpush.bf16.msra.mxu2 %v1090_v2  ;;  %v1098_v6 = vld [vmem:[#allocation5 + $0xf8] sm:$0xff]  ;;  %v1097_v7 = vld [vmem:[#allocation5 + $0xf0] sm:$0xff]  ;;  %v1088_v10 = vld [vmem:[#allocation5 + $0xa8] sm:$0xff] }
  0x1a   :  { %563 = vmatpush.bf16.msra.mxu3 %v1098_v6  ;;  %v1096_v11 = vld [vmem:[#allocation5 + $0xe8] sm:$0xff]  ;;  %v1071_v12 = vld [vmem:[#allocation5 + $0x20] sm:$0xff]  ;;  %v1070_v16 = vld [vmem:[#allocation5 + $0x18] sm:$0xff] }
  0x1b   :  { %525 = vmatpush.bf16.msra.mxu0 %v1073_v3  ;;  %v1079_v13 = vld [vmem:[#allocation5 + $0x60] sm:$0xff]  ;;  %v1078_v17 = vld [vmem:[#allocation5 + $0x58] sm:$0xff]  ;;  %v1069_v20 = vld [vmem:[#allocation5 + $0x10] sm:$0xff] }
  0x1c   :  { %538 = vmatpush.bf16.msra.mxu1 %v1081_v4  ;;  %v1087_v14 = vld [vmem:[#allocation5 + $0xa0] sm:$0xff]  ;;  %v1086_v18 = vld [vmem:[#allocation5 + $0x98] sm:$0xff]  ;;  %v1077_v21 = vld [vmem:[#allocation5 + $0x50] sm:$0xff] }
  0x1d   :  { %551 = vmatpush.bf16.msra.mxu2 %v1089_v5  ;;  %v1095_v15 = vld [vmem:[#allocation5 + $0xe0] sm:$0xff]  ;;  %v1094_v19 = vld [vmem:[#allocation5 + $0xd8] sm:$0xff]  ;;  %v1085_v22 = vld [vmem:[#allocation5 + $0x90] sm:$0xff] }
  0x1e   :  { %564 = vmatpush.bf16.msra.mxu3 %v1097_v7  ;;  %v1093_v23 = vld [vmem:[#allocation5 + $0xd0] sm:$0xff]  ;;  %v1068_v24 = vld [vmem:[#allocation5 + $0x8] sm:$0xff]  ;;  %v1067_v27 = vld [vmem:[#allocation5] sm:$0xff] }
  0x1f   :  { %526 = vmatpush.bf16.msra.mxu0 %v1072_v8  ;;  %v1076_v25 = vld [vmem:[#allocation5 + $0x48] sm:$0xff]  ;;  %v1075_v29 = vld [vmem:[#allocation5 + $0x40] sm:$0xff]  ;;  %v103_v31 = vld [vmem:[#allocation2 + $0x8] sm:$0xff] }
  0x20   :  { %539 = vmatpush.bf16.msra.mxu1 %v1080_v9  ;;  %v1084_v26 = vld [vmem:[#allocation5 + $0x88] sm:$0xff]  ;;  %v1106_v32 = vld [vmem:[#allocation5 + $0x138] sm:$0xff]  ;;  %v1083_v34 = vld [vmem:[#allocation5 + $0x80] sm:$0xff]  ;;  %v110_v37 = vpack.c.bf16 %v103_v31, %v103_v31 }
  0x21   :  { %552 = vmatpush.bf16.msra.mxu2 %v1088_v10  ;;  %v1092_v28 = vld [vmem:[#allocation5 + $0xc8] sm:$0xff]  ;;  %v1114_v33 = vld [vmem:[#allocation5 + $0x178] sm:$0xff]  ;;  %v1091_v38 = vld [vmem:[#allocation5 + $0xc0] sm:$0xff] }
  0x22   :  { %565 = vmatpush.bf16.msra.mxu3 %v1096_v11  ;;  %v102_v30 = vld [vmem:[#allocation2] sm:$0xff]  ;;  %v104_v35 = vld [vmem:[#allocation2 + $0x10] sm:$0xff]  ;;  %v105_v40 = vld [vmem:[#allocation2 + $0x18] sm:$0xff] }
  0x23   :  { %527 = vmatpush.bf16.msra.mxu0 %v1071_v12  ;;  %v109_v36 = vpack.c.bf16 %v102_v30, %v102_v30  ;;  %v1116_v39 = vld [vmem:[#allocation5 + $0x188] sm:$0xff]  ;;  %v1105_v41 = vld [vmem:[#allocation5 + $0x130] sm:$0xff]  ;;  %v111_v43 = vpack.c.bf16 %v104_v35, %v104_v35  ;;  %v112_v44 = vpack.c.bf16 %v105_v40, %v105_v40  ;;  %v1115_v45 = vld [vmem:[#allocation5 + $0x180] sm:$0xff] }
  0x24   :  { %540 = vmatpush.bf16.msra.mxu1 %v1079_v13  ;;  %v1113_v42 = vld [vmem:[#allocation5 + $0x170] sm:$0xff]  ;;  %v1104_v46 = vld [vmem:[#allocation5 + $0x128] sm:$0xff]  ;;  %v1103_v48 = vld [vmem:[#allocation5 + $0x120] sm:$0xff] }
  0x25   :  { %553 = vmatpush.bf16.msra.mxu2 %v1087_v14  ;;  %v1112_v47 = vld [vmem:[#allocation5 + $0x168] sm:$0xff]  ;;  %v1111_v49 = vld [vmem:[#allocation5 + $0x160] sm:$0xff]  ;;  %v1102_v50 = vld [vmem:[#allocation5 + $0x118] sm:$0xff] }
  0x26   :  { %566 = vmatpush.bf16.msra.mxu3 %v1095_v15  ;;  %v1110_v51 = vld [vmem:[#allocation5 + $0x158] sm:$0xff]  ;;  %v1101_v53 = vld [vmem:[#allocation5 + $0x110] sm:$0xff]  ;;  %v1100_v56 = vld [vmem:[#allocation5 + $0x108] sm:$0xff] }
  0x27   :  { %528 = vmatpush.bf16.msra.mxu0 %v1070_v16  ;;  %v108_v52 = vld [vmem:[#allocation2 + $0x30] sm:$0xff]  ;;  %v1109_v54 = vld [vmem:[#allocation5 + $0x150] sm:$0xff]  ;;  %v1108_v57 = vld [vmem:[#allocation5 + $0x148] sm:$0xff] }
  0x28   :  { %541 = vmatpush.bf16.msra.mxu1 %v1078_v17  ;;  %v115_v55 = vpack.c.bf16 %v108_v52, %v108_v52  ;;  %v1099_v58 = vld [vmem:[#allocation5 + $0x100] sm:$0xff]  ;;  %v106_v60 = vld [vmem:[#allocation2 + $0x20] sm:$0xff]  ;;  %v107_v61 = vld [vmem:[#allocation2 + $0x28] sm:$0xff] }
  0x29   :  { %554 = vmatpush.bf16.msra.mxu2 %v1086_v18  ;;  %v1107_v59 = vld [vmem:[#allocation5 + $0x140] sm:$0xff]  ;;  %v113_v62 = vpack.c.bf16 %v106_v60, %v106_v60  ;;  %v114_v63 = vpack.c.bf16 %v107_v61, %v107_v61  ;;  %v1124_v0 = vld [vmem:[#allocation8 + $0x38] sm:$0xff]  ;;  %v1121_v3 = vld [vmem:[#allocation8 + $0x20] sm:$0xff] }
  0x2a   :  { %567 = vmatpush.bf16.msra.mxu3 %v1094_v19  ;;  %v1123_v1 = vld [vmem:[#allocation8 + $0x30] sm:$0xff]  ;;  %v1122_v2 = vld [vmem:[#allocation8 + $0x28] sm:$0xff]  ;;  %v1120_v4 = vld [vmem:[#allocation8 + $0x18] sm:$0xff] }
  0x2b   :  { %529 = vmatpush.bf16.msra.mxu0 %v1069_v20  ;;  %v1119_v5 = vld [vmem:[#allocation8 + $0x10] sm:$0xff]  ;;  %v1118_v6 = vld [vmem:[#allocation8 + $0x8] sm:$0xff]  ;;  %v1117_v9 = vld [vmem:[#allocation8] sm:$0xff] }
  0x2c   :  { %542 = vmatpush.bf16.msra.mxu1 %v1077_v21  ;;  %v1132_v12 = vld [vmem:[#allocation10 + $0x38] sm:$0xff]  ;;  %v1131_v15 = vld [vmem:[#allocation10 + $0x30] sm:$0xff]  ;;  %v1130_v17 = vld [vmem:[#allocation10 + $0x28] sm:$0xff] }
  0x2d   :  { %555 = vmatpush.bf16.msra.mxu2 %v1085_v22  ;;  %v1141_v16 = vld [vmem:[#allocation7] ss:$0 sm:$0xff]  ;;  %v1129_v21 = vld [vmem:[#allocation10 + $0x20] sm:$0xff]  ;;  %v1142_v40 = vld [vmem:[%s1372_s4] ss:$0 sm:$0xff] }
  0x2e   :  { %568 = vmatpush.bf16.msra.mxu3 %v1093_v23  ;;  %v1128_v23 = vld [vmem:[#allocation10 + $0x18] sm:$0xff] }
  0x2f   :  { %530 = vmatpush.bf16.msra.mxu0 %v1068_v24 }
  0x30   :  { %543 = vmatpush.bf16.msra.mxu1 %v1076_v25 }
  0x31   :  { %556 = vmatpush.bf16.msra.mxu2 %v1084_v26  ;;  %v1127_v26 = vld [vmem:[#allocation10 + $0x10] sm:$0xff] }
  0x32   :  { %569 = vmatpush.bf16.msra.mxu3 %v1092_v28 }
  0x33   :  { %531 = vmatpush.bf16.msra.mxu0 %v1067_v27 }
  0x34   :  { %544 = vmatpush.bf16.msra.mxu1 %v1075_v29 }
  0x35   :  { %557 = vmatpush.bf16.msra.mxu2 %v1083_v34 }
  0x36   :  { %532 = vmatmul.bf16.vlgmr.msra.gmra.mxu0 %v109_v36  ;;  %570 = vmatpush.bf16.msra.mxu3 %v1091_v38  ;;  %v1126_v38 = vld [vmem:[#allocation10 + $0x8] sm:$0xff] }
  0x37   :  { %576 = vmatpush.bf16.msrb.mxu0 %v1106_v32  ;;  %545 = vmatmul.bf16.vlgmr.msra.gmra.mxu1 %v110_v37 }
  0x38   :  { %589 = vmatpush.bf16.msrb.mxu1 %v1114_v33  ;;  %558 = vmatmul.bf16.vlgmr.msra.gmra.mxu2 %v111_v43 }
  0x39   :  { %608 = vmatpush.bf16.msrb.mxu2 %v1116_v39  ;;  %571 = vmatmul.bf16.vlgmr.msra.gmra.mxu3 %v112_v44  ;;  %v1125_v39 = vld [vmem:[#allocation10] sm:$0xff] }
  0x3a   :  { %685 = vmatpush.bf16.msrb.mxu3 %v1124_v0 }
  0x3b   :  { %577 = vmatpush.bf16.msrb.mxu0 %v1105_v41 }
  0x3c   :  { %590 = vmatpush.bf16.msrb.mxu1 %v1113_v42 }
  0x3d   :  { %609 = vmatpush.bf16.msrb.mxu2 %v1115_v45 }
  0x3e   :  { %686 = vmatpush.bf16.msrb.mxu3 %v1123_v1 }
  0x3f   :  { %578 = vmatpush.bf16.msrb.mxu0 %v1104_v46  ;;  %v1143_v46 = vld [vmem:[%s1374_s6] ss:$0 sm:$0xff] }
  0x40   :  { %591 = vmatpush.bf16.msrb.mxu1 %v1112_v47 }
  0x41   :  { %768 = vmatpush.bf16.msra.mxu2 %v1132_v12 }
  0x42   :  { %687 = vmatpush.bf16.msrb.mxu3 %v1122_v2 }
  0x43   :  { %579 = vmatpush.bf16.msrb.mxu0 %v1103_v48 }
  0x44   :  { %592 = vmatpush.bf16.msrb.mxu1 %v1111_v49 }
  0x45   :  { %769 = vmatpush.bf16.msra.mxu2 %v1131_v15 }
  0x46   :  { %688 = vmatpush.bf16.msrb.mxu3 %v1121_v3 }
  0x47   :  { %580 = vmatpush.bf16.msrb.mxu0 %v1102_v50 }
  0x48   :  { %593 = vmatpush.bf16.msrb.mxu1 %v1110_v51  ;;  %1002 = vmatmul.msk.bf16.vlgmr.msrb.gmra.mxu2 %vm520_vm0, %v115_v55 }
  0x49   :  { %770 = vmatpush.bf16.msra.mxu2 %v1130_v17 }
  0x4a   :  { %689 = vmatpush.bf16.msrb.mxu3 %v1120_v4 }
  0x4b   :  { %581 = vmatpush.bf16.msrb.mxu0 %v1101_v53 }
  0x4c   :  { %594 = vmatpush.bf16.msrb.mxu1 %v1109_v54 }
  0x4d   :  { %771 = vmatpush.bf16.msra.mxu2 %v1129_v21 }
  0x4e   :  { %690 = vmatpush.bf16.msrb.mxu3 %v1119_v5 }
  0x4f   :  { %582 = vmatpush.bf16.msrb.mxu0 %v1100_v56 }
  0x50   :  { %595 = vmatpush.bf16.msrb.mxu1 %v1108_v57 }
  0x51   :  { %772 = vmatpush.bf16.msra.mxu2 %v1128_v23 }
  0x52   :  { %691 = vmatpush.bf16.msrb.mxu3 %v1118_v6 }
  0x53   :  { %583 = vmatpush.bf16.msrb.mxu0 %v1099_v58 }
  0x54   :  { %596 = vmatpush.bf16.msrb.mxu1 %v1107_v59 }
  0x55   :  { %773 = vmatpush.bf16.msra.mxu2 %v1127_v26 }
  0x56   :  { %584 = vmatmul.bf16.vlgmr.msrb.gmra.mxu0 %v113_v62  ;;  %692 = vmatpush.bf16.msrb.mxu3 %v1117_v9 }
  0x57   :  { %597 = vmatmul.bf16.vlgmr.msrb.gmra.mxu1 %v114_v63 }
  0x59   :  { %774 = vmatpush.bf16.msra.mxu2 %v1126_v38 }
  0x5d   :  { %775 = vmatpush.bf16.msra.mxu2 %v1125_v39 }
  0xb3   :  { %v533_v7 = vpop.f32.mrf.mxu0 }
  0xb4   :  { %v546_v8 = vpop.f32.mrf.mxu1  ;;  %v534_v18 = vadd.f32 %v1141_v16, %v533_v7 }
  0xb6   :  { %v547_v22 = vadd.f32 %v546_v8, %v534_v18 }
  0xbb   :  { %v535_v10 = vpop.f32.mrf.mxu0  ;;  %v559_v13 = vpop.f32.mrf.mxu2 }
  0xbc   :  { %v548_v11 = vpop.f32.mrf.mxu1  ;;  %v572_v14 = vpop.f32.mrf.mxu3  ;;  %v560_v24 = vadd.f32 %v559_v13, %v547_v22 }
  0xbe   :  { %v573_v27 = vadd.f32 %v572_v14, %v560_v24 }
  0xc3   :  { %v561_v19 = vpop.f32.mrf.mxu2 }
  0xc4   :  { %v574_v20 = vpop.f32.mrf.mxu3 }
  0xcb   :  { %v611_v25 = vpop.f32.mrf.mxu2 }
  0xd3   :  { %v585_v28 = vpop.f32.mrf.mxu0  ;;  %v613_v32 = vpop.f32.mrf.mxu2 }
  0xd4   :  { %v598_v29 = vpop.f32.mrf.mxu1  ;;  %v586_v30 = vadd.f32 %v585_v28, %v573_v27 }
  0xd6   :  { %v599_v31 = vadd.f32 %v598_v29, %v586_v30 }
  0xd8   :  { %v612_v33 = vadd.f32 %v611_v25, %v599_v31 }
  0xda   :  { %v615_v34 = vmax.f32 %v612_v33, 0.0 }
  0xdb   :  { %v587_v35 = vpop.f32.mrf.mxu0 }
  0xdc   :  { %v600_v36 = vpop.f32.mrf.mxu1  ;;  %v616_v37 = vpack.c.bf16 %v615_v34, %v615_v34 }
  0xde   :  { %693 = vmatmul.bf16.vlgmr.msrb.gmra.mxu3 %v616_v37 }
 0x161   :  { %v694_v41 = vpop.f32.mrf.mxu3 }
 0x162   :  { %v695_v42 = vadd.f32 %v1142_v40, %v694_v41 }
 0x164   :  { %v698_v43 = vmax.f32 %v695_v42, 0.0 }
 0x166   :  { %v699_v44 = vpack.c.bf16 %v698_v43, %v698_v43 }
 0x168   :  { %776 = vmatmul.bf16.vlgmr.msra.gmra.mxu2 %v699_v44 }
 0x169   :  { %v696_v45 = vpop.f32.mrf.mxu3 }
 0x1eb   :  { %v777_v47 = vpop.f32.mrf.mxu2 }
 0x1ec   :  { %v778_v48 = vadd.f32 %v1143_v46, %v777_v47 }
 0x1ee   :  { %782 = vst.msk [vmem:[#allocation11] sm:$0xff] %vm781_vm1, %v778_v48 }
 0x1ef   :  { %793 = dma.vmem_to_hbm [thread:$0]  %s789_s28, 128, %s791_s8, [#allocation4]  }
 0x1f3   :  { %v779_v49 = vpop.f32.mrf.mxu2 }
 0x1f4   :  { %1294 = dma.done.wait [#allocation4], 128  }
 0x1f5   :  { %1295 = vsyncadd [#allocation4], 4294967168 }
 0x1f6   :  { %798 = vsyncpa [#allocation3], 1 }
 0x1f7   :  { %799 = vsyncpa [#allocation6], 1 }
 0x1f8   :  { %800 = vsyncpa [#allocation9], 1 }
 0x1f9   :  { %801 = vsyncpa [#allocation4], 1 }

</bundles_post_ra>
